<compile_context>
chip_gen: v7x
topology: tpu7x:2x2x1
jax: 0.10.0
libtpu: 0.0.40
codegen_flags: <defaults>
</compile_context>

<pallas_src>
import functools

import jax
import jax.numpy as jnp
from jax import lax
from jax.experimental import pallas as pl
from jax.experimental.pallas import tpu as pltpu

LANE = 128
SUBLANE = 8


def _dloss_kernel(pos_ref, neg_ref, pacc_ref, nacc_ref, *,
                  row_tile, inner_steps, valid_rows):
    p = pl.program_id(0)   # parallel partition (megacore split)
    i = pl.program_id(1)   # sequential reduction step within the partition

    @pl.when(i == 0)
    def _():
        pacc_ref[...] = jnp.zeros_like(pacc_ref)
        nacc_ref[...] = jnp.zeros_like(nacc_ref)

    # Row validity mask: this tile's logical rows may extend past the end of
    # the slab (partial last tile / surplus blocks from the parallel split).
    # Masking BEFORE the log replaces any out-of-bounds garbage with a
    # loss-neutral value, so those rows contribute exactly 0.
    base_row = (p * inner_steps + i) * row_tile
    row_ids = lax.broadcasted_iota(jnp.int32, (row_tile, LANE), 0)
    valid = (row_ids + base_row) < valid_rows

    pos = jnp.where(valid, pos_ref[...].astype(jnp.float32), 1.0)  # log(1)   = 0
    neg = jnp.where(valid, neg_ref[...].astype(jnp.float32), 0.0)  # log(1-0) = 0

    lp = jnp.log(pos)
    ln = jnp.log(1.0 - neg)

    # Fold (row_tile, 128) into the lane-shaped (8, 128) accumulator with
    # vreg-wise VPU adds; the single cross-lane reduce happens in the wrapper.
    k = row_tile // SUBLANE
    pacc_ref[...] += jnp.sum(lp.reshape(k, SUBLANE, LANE), axis=0)
    nacc_ref[...] += jnp.sum(ln.reshape(k, SUBLANE, LANE), axis=0)


def _to_slab(x, neutral):
    """Flatten to a (rows, 128) slab with rows a multiple of 8.

    Free (no copy) when x.size is a multiple of 8*128; otherwise only the
    ragged tail is padded with the loss-neutral value.
    """
    flat = jnp.ravel(x)
    n = flat.shape[0]
    chunk = SUBLANE * LANE
    padded_n = ((n + chunk - 1) // chunk) * chunk
    if padded_n != n:
        flat = jnp.pad(flat, (0, padded_n - n), constant_values=neutral)
    return flat.reshape(padded_n // LANE, LANE)


def dloss(positive_output_batch, negative_output_batch, *, row_tile=1024):
    """Returns (p_loss + n_loss, p_loss, n_loss) as float32 scalars."""
    assert positive_output_batch.shape == negative_output_batch.shape
    count = positive_output_batch.size

    pos_slab = _to_slab(positive_output_batch, 1.0)
    neg_slab = _to_slab(negative_output_batch, 0.0)
    rows = pos_slab.shape[0]  # multiple of 8 by construction

    # Tile sizing: big blocks to amortize per-step overhead; multiple of 16 so
    # bf16 inputs are also legal.  A single full-slab block for small inputs.
    if row_tile >= rows:
        row_tile = rows
        total_blocks = 1
    else:
        row_tile = max(16, (row_tile // 16) * 16)
        total_blocks = pl.cdiv(rows, row_tile)

    # Split the block range across (up to) 2 TensorCores (v7x megacore).
    num_parts = 2 if total_blocks >= 2 else 1
    inner_steps = pl.cdiv(total_blocks, num_parts)
    grid = (num_parts, inner_steps)

    def in_index_map(p, i):
        blk = p * inner_steps + i
        # Clamp so surplus steps (when total_blocks % num_parts != 0) never
        # DMA a fully out-of-range block; their rows are masked in-kernel.
        return (jnp.minimum(blk, total_blocks - 1), 0)

    out_spec = pl.BlockSpec((None, SUBLANE, LANE), lambda p, i: (p, 0, 0))
    out_shape = jax.ShapeDtypeStruct((num_parts, SUBLANE, LANE), jnp.float32)

    kernel = functools.partial(
        _dloss_kernel,
        row_tile=row_tile,
        inner_steps=inner_steps,
        valid_rows=rows,
    )

    p_parts, n_parts = pl.pallas_call(
        kernel,
        out_shape=(out_shape, out_shape),
        grid_spec=pltpu.PrefetchScalarGridSpec(
            num_scalar_prefetch=0,
            grid=grid,
            in_specs=[
                pl.BlockSpec((row_tile, LANE), in_index_map),
                pl.BlockSpec((row_tile, LANE), in_index_map),
            ],
            out_specs=[out_spec, out_spec],
        ),
        compiler_params=pltpu.CompilerParams(
            dimension_semantics=("parallel", "arbitrary"),
            vmem_limit_bytes=32 * 1024 * 1024,
        ),
    )(pos_slab, neg_slab)

    # Tiny final reduction + scaling in plain JAX (2 * 8 * 128 values).
    inv_count = 1.0 / float(count)
    p_loss = -jnp.sum(p_parts) * inv_count
    n_loss = -jnp.sum(n_parts) * inv_count
    return p_loss + n_loss, p_loss, n_loss


def _check(pos, neg, *, row_tile=1024, rtol=1e-5, atol=1e-5):
    total, p_loss, n_loss = dloss(pos, neg, row_tile=row_tile)
    jax.block_until_ready((total, p_loss, n_loss))
    p_ref = -jnp.mean(jnp.log(pos.astype(jnp.float32)))
    n_ref = -jnp.mean(jnp.log(1.0 - neg.astype(jnp.float32)))
    t_ref = p_ref + n_ref
    assert jnp.allclose(p_loss, p_ref, rtol=rtol, atol=atol)
    assert jnp.allclose(n_loss, n_ref, rtol=rtol, atol=atol)
    assert jnp.allclose(total, t_ref, rtol=rtol, atol=atol)


if __name__ == "__main__":
    key = jax.random.PRNGKey(0)
    kp, kn, kp2, kn2, kp3, kn3 = jax.random.split(key, 6)

    # Small shape consistent with a discriminator output batch (NCHW).
    # Outputs are probabilities in (0, 1); keep strictly inside.
    shape = (2, 4, 16, 16)
    pos = jax.random.uniform(kp, shape, jnp.float32, minval=0.05, maxval=0.95)
    neg = jax.random.uniform(kn, shape, jnp.float32, minval=0.05, maxval=0.95)
    _check(pos, neg)

    # Ragged size (not a multiple of 8*128): exercises the neutral tail pad.
    shape2 = (2, 3, 10, 10)
    pos2 = jax.random.uniform(kp2, shape2, jnp.float32, minval=0.05, maxval=0.95)
    neg2 = jax.random.uniform(kn2, shape2, jnp.float32, minval=0.05, maxval=0.95)
    _check(pos2, neg2)

    # Multi-block + parallel split + partial last tile + clamped surplus step.
    shape3 = (4, 8, 72, 64)
    pos3 = jax.random.uniform(kp3, shape3, jnp.float32, minval=0.05, maxval=0.95)
    neg3 = jax.random.uniform(kn3, shape3, jnp.float32, minval=0.05, maxval=0.95)
    _check(pos3, neg3, row_tile=80, rtol=1e-4, atol=1e-5)

    print("KERNEL_OK")
</pallas_src>

<mosaic_0001>
module attributes {stable_mosaic.version = 11 : i64} {
  func.func @_dloss_kernel(%arg0: i32, %arg1: i32, %arg2: memref<16x128xf32, #tpu.memory_space<vmem>>, %arg3: memref<16x128xf32, #tpu.memory_space<vmem>>, %arg4: memref<1x8x128xf32, #tpu.memory_space<vmem>>, %arg5: memref<1x8x128xf32, #tpu.memory_space<vmem>>) attributes {dimension_semantics = [#tpu.dimension_semantics<parallel>, #tpu.dimension_semantics<arbitrary>], iteration_bounds = array<i64: 1, 1>, scalar_prefetch = 0 : i64, scratch_operands = 0 : i64, tpu.core_type = #tpu.core_type<tc>, window_params = [{transform_indices = @transform_0, window_bounds = array<i64: 16, 128>}, {transform_indices = @transform_1, window_bounds = array<i64: 16, 128>}, {transform_indices = @transform_2, window_bounds = array<i64: 1, 8, 128>}, {transform_indices = @transform_3, window_bounds = array<i64: 1, 8, 128>}]} {
    %c0_i32 = arith.constant 0 : i32
    %0 = arith.cmpi eq, %arg1, %c0_i32 : i32
    %1 = arith.extui %0 : i1 to i32
    %c0_i32_0 = arith.constant 0 : i32
    %2 = arith.cmpi ne, %1, %c0_i32_0 : i32
    scf.if %2 {
      %cst_21 = arith.constant 0.000000e+00 : f32
      %37 = vector.broadcast %cst_21 : f32 to vector<8x128xf32>
      %c0_22 = arith.constant 0 : index
      %c0_23 = arith.constant 0 : index
      %c0_24 = arith.constant 0 : index
      %38 = vector.load %arg4[%c0_22, %c0_23, %c0_24] : memref<1x8x128xf32, #tpu.memory_space<vmem>>, vector<1x8x128xf32>
      %39 = vector.shape_cast %38 : vector<1x8x128xf32> to vector<8x128xf32>
      %40 = vector.shape_cast %37 : vector<8x128xf32> to vector<1x8x128xf32>
      tpu.vector_store %arg4[%c0_22, %c0_23, %c0_24], %40 {strides = array<i32>} : memref<1x8x128xf32, #tpu.memory_space<vmem>>, vector<1x8x128xf32>,
      %cst_25 = arith.constant 0.000000e+00 : f32
      %41 = vector.broadcast %cst_25 : f32 to vector<8x128xf32>
      %c0_26 = arith.constant 0 : index
      %c0_27 = arith.constant 0 : index
      %c0_28 = arith.constant 0 : index
      %42 = vector.load %arg5[%c0_26, %c0_27, %c0_28] : memref<1x8x128xf32, #tpu.memory_space<vmem>>, vector<1x8x128xf32>
      %43 = vector.shape_cast %42 : vector<1x8x128xf32> to vector<8x128xf32>
      %44 = vector.shape_cast %41 : vector<8x128xf32> to vector<1x8x128xf32>
      tpu.vector_store %arg5[%c0_26, %c0_27, %c0_28], %44 {strides = array<i32>} : memref<1x8x128xf32, #tpu.memory_space<vmem>>, vector<1x8x128xf32>,
    } else {
    }
    %c1_i32 = arith.constant 1 : i32
    %3 = arith.muli %arg0, %c1_i32 : i32
    %4 = arith.addi %3, %arg1 : i32
    %c16_i32 = arith.constant 16 : i32
    %5 = arith.muli %4, %c16_i32 : i32
    %6 = tpu.iota {dimensions = array<i32: 0>} : vector<16x128xi32>
    %7 = vector.broadcast %5 : i32 to vector<16x128xi32>
    %8 = arith.addi %6, %7 : vector<16x128xi32>
    %c16_i32_1 = arith.constant 16 : i32
    %9 = vector.broadcast %c16_i32_1 : i32 to vector<16x128xi32>
    %10 = arith.cmpi slt, %8, %9 : vector<16x128xi32>
    %c0 = arith.constant 0 : index
    %c0_2 = arith.constant 0 : index
    %11 = vector.load %arg2[%c0, %c0_2] : memref<16x128xf32, #tpu.memory_space<vmem>>, vector<16x128xf32>
    %cst = arith.constant 1.000000e+00 : f32
    %12 = vector.broadcast %cst : f32 to vector<16x128xf32>
    %13 = arith.select %10, %11, %12 : vector<16x128xi1>, vector<16x128xf32>
    %c0_3 = arith.constant 0 : index
    %c0_4 = arith.constant 0 : index
    %14 = vector.load %arg3[%c0_3, %c0_4] : memref<16x128xf32, #tpu.memory_space<vmem>>, vector<16x128xf32>
    %cst_5 = arith.constant 0.000000e+00 : f32
    %15 = vector.broadcast %cst_5 : f32 to vector<16x128xf32>
    %16 = arith.select %10, %14, %15 : vector<16x128xi1>, vector<16x128xf32>
    %17 = math.log %13 : vector<16x128xf32>
    %cst_6 = arith.constant 1.000000e+00 : f32
    %18 = vector.broadcast %cst_6 : f32 to vector<16x128xf32>
    %19 = arith.subf %18, %16 : vector<16x128xf32>
    %20 = math.log %19 : vector<16x128xf32>
    %c0_7 = arith.constant 0 : index
    %c0_8 = arith.constant 0 : index
    %c0_9 = arith.constant 0 : index
    %21 = vector.load %arg4[%c0_7, %c0_8, %c0_9] : memref<1x8x128xf32, #tpu.memory_space<vmem>>, vector<1x8x128xf32>
    %22 = vector.shape_cast %21 : vector<1x8x128xf32> to vector<8x128xf32>
    %23 = vector.shape_cast %17 : vector<16x128xf32> to vector<2x8x128xf32>
    %cst_10 = arith.constant dense<0.000000e+00> : vector<8x128xf32>
    %24 = vector.multi_reduction <add>, %23, %cst_10 [0] : vector<2x8x128xf32> to vector<8x128xf32>
    %25 = arith.addf %22, %24 : vector<8x128xf32>
    %c0_11 = arith.constant 0 : index
    %c0_12 = arith.constant 0 : index
    %c0_13 = arith.constant 0 : index
    %26 = vector.load %arg4[%c0_11, %c0_12, %c0_13] : memref<1x8x128xf32, #tpu.memory_space<vmem>>, vector<1x8x128xf32>
    %27 = vector.shape_cast %26 : vector<1x8x128xf32> to vector<8x128xf32>
    %28 = vector.shape_cast %25 : vector<8x128xf32> to vector<1x8x128xf32>
    tpu.vector_store %arg4[%c0_11, %c0_12, %c0_13], %28 {strides = array<i32>} : memref<1x8x128xf32, #tpu.memory_space<vmem>>, vector<1x8x128xf32>,
    %c0_14 = arith.constant 0 : index
    %c0_15 = arith.constant 0 : index
    %c0_16 = arith.constant 0 : index
    %29 = vector.load %arg5[%c0_14, %c0_15, %c0_16] : memref<1x8x128xf32, #tpu.memory_space<vmem>>, vector<1x8x128xf32>
    %30 = vector.shape_cast %29 : vector<1x8x128xf32> to vector<8x128xf32>
    %31 = vector.shape_cast %20 : vector<16x128xf32> to vector<2x8x128xf32>
    %cst_17 = arith.constant dense<0.000000e+00> : vector<8x128xf32>
    %32 = vector.multi_reduction <add>, %31, %cst_17 [0] : vector<2x8x128xf32> to vector<8x128xf32>
    %33 = arith.addf %30, %32 : vector<8x128xf32>
    %c0_18 = arith.constant 0 : index
    %c0_19 = arith.constant 0 : index
    %c0_20 = arith.constant 0 : index
    %34 = vector.load %arg5[%c0_18, %c0_19, %c0_20] : memref<1x8x128xf32, #tpu.memory_space<vmem>>, vector<1x8x128xf32>
    %35 = vector.shape_cast %34 : vector<1x8x128xf32> to vector<8x128xf32>
    %36 = vector.shape_cast %33 : vector<8x128xf32> to vector<1x8x128xf32>
    tpu.vector_store %arg5[%c0_18, %c0_19, %c0_20], %36 {strides = array<i32>} : memref<1x8x128xf32, #tpu.memory_space<vmem>>, vector<1x8x128xf32>,
    return
  }
  func.func @transform_0(%arg0: i32, %arg1: i32) -> (i32, i32) {
    %c1_i32 = arith.constant 1 : i32
    %0 = arith.muli %arg0, %c1_i32 : i32
    %1 = arith.addi %0, %arg1 : i32
    %c0_i32 = arith.constant 0 : i32
    %2 = arith.minsi %1, %c0_i32 : i32
    %c0_i32_0 = arith.constant 0 : i32
    %c0_i32_1 = arith.constant 0 : i32
    return %2, %c0_i32_0 : i32, i32
  }
  func.func @transform_1(%arg0: i32, %arg1: i32) -> (i32, i32) {
    %c1_i32 = arith.constant 1 : i32
    %0 = arith.muli %arg0, %c1_i32 : i32
    %1 = arith.addi %0, %arg1 : i32
    %c0_i32 = arith.constant 0 : i32
    %2 = arith.minsi %1, %c0_i32 : i32
    %c0_i32_0 = arith.constant 0 : i32
    %c0_i32_1 = arith.constant 0 : i32
    return %2, %c0_i32_0 : i32, i32
  }
  func.func @transform_2(%arg0: i32, %arg1: i32) -> (i32, i32, i32) {
    %c0_i32 = arith.constant 0 : i32
    %c0_i32_0 = arith.constant 0 : i32
    %c0_i32_1 = arith.constant 0 : i32
    return %arg0, %c0_i32, %c0_i32_0 : i32, i32, i32
  }
  func.func @transform_3(%arg0: i32, %arg1: i32) -> (i32, i32, i32) {
    %c0_i32 = arith.constant 0 : i32
    %c0_i32_0 = arith.constant 0 : i32
    %c0_i32_1 = arith.constant 0 : i32
    return %arg0, %c0_i32, %c0_i32_0 : i32, i32, i32
  }
}

</mosaic_0001>

<bundles_post_ra>
// kernel: tpu_custom_call.1
= control target key start
LH: loop header
LB: loop body
LE: loop exit
PB: predicated region body
PF: predicated region fallthrough
CT: control target
= control target key end

     0   :  { %9 = vsyncpa [#allocation3], 0  ;;  %s324_s0 = inlined_call_operand.hbm [shape: f32[16,128], index: 0, kind: input, shape index: {}]   ;;  %s325_s1 = inlined_call_operand.hbm [shape: f32[16,128], index: 1, kind: input, shape index: {}]   ;;  %s326_s2 = inlined_call_operand.hbm [shape: f32[1,8,128], index: 2, kind: output, shape index: {0}]   ;;  %s327_s3 = inlined_call_operand.hbm [shape: f32[1,8,128], index: 3, kind: output, shape index: {1}]  }
   0x1   :  { %10 = vsyncpa [#allocation6], 0 }
   0x2   :  { %11 = vsyncpa [#allocation4], 0 }
   0x3   :  { %12 = vsyncpa [#allocation9], 0  ;;  %s250_s12 = smov [#allocation2]   ;;  %s154_s16 = scalar_lea.hbm %s324_s0, 256 }
   0x4   :  { %s24_s13 = sshll.u32 %s250_s12, 4  ;;  %p155_p0 = scmp.ne.s32.totalorder %s324_s0, %s154_s16  ;;  %s25_s13 = int_to_ptr.vmem [resolvable:$true] %s24_s13 }
   0x5   :  { %p158_p1 = scmp.lt.u32.totalorder %s154_s16, %s324_s0 }
   0x7   :  { %p160_p2 = pnand %p158_p1, %p155_p0 }
   0x9   :  { %163 = shalt.err (!%p160_p2)
}
   0xa   :  { %s164_s21 = scalar_lea.vmem %s25_s13, 256  ;;  %p169_p4 = scmp.lt.s32.totalorder %s25_s13, %s25_s13 }
   0xb   :  { %p165_p3 = scmp.ne.s32.totalorder %s25_s13, %s164_s21  ;;  %p170_p5 = scmp.lt.s32.totalorder %s164_s21, %s164_s21 }
   0xd   :  { %p171_p6 = por %p170_p5, %p169_p4 }
   0xf   :  { %p172_p7 = pnand %p171_p6, %p165_p3 }
  0x11   :  { %175 = shalt.err (!%p172_p7)
}
  0x12   :  { %s251_s22 = smov 128   ;;  %s252_s23 = smov 8  }
  0x13   :  { %30 = dma.hbm_to_vmem [thread:$0]  %s324_s0, 256, %s25_s13, [#allocation3], %s251_s22, %s251_s22, %s252_s23  }
  0x14   :  { %s253_s26 = smov [#allocation5]   ;;  %s176_s30 = scalar_lea.hbm %s325_s1, 256 }
  0x15   :  { %s42_s27 = sshll.u32 %s253_s26, 4  ;;  %p177_p8 = scmp.ne.s32.totalorder %s325_s1, %s176_s30  ;;  %s43_s27 = int_to_ptr.vmem [resolvable:$true] %s42_s27 }
  0x16   :  { %p180_p9 = scmp.lt.u32.totalorder %s176_s30, %s325_s1 }
  0x18   :  { %p182_p10 = pnand %p180_p9, %p177_p8 }
  0x1a   :  { %185 = shalt.err (!%p182_p10)
}
  0x1b   :  { %s186_s8 = scalar_lea.vmem %s43_s27, 256  ;;  %p191_p12 = scmp.lt.s32.totalorder %s43_s27, %s43_s27 }
  0x1c   :  { %p187_p11 = scmp.ne.s32.totalorder %s43_s27, %s186_s8  ;;  %p192_p13 = scmp.lt.s32.totalorder %s186_s8, %s186_s8 }
  0x1e   :  { %p193_p0 = por %p192_p13, %p191_p12 }
  0x20   :  { %p194_p1 = pnand %p193_p0, %p187_p11 }
  0x22   :  { %197 = shalt.err (!%p194_p1)
}
  0x23   :  { %48 = dma.hbm_to_vmem [thread:$0]  %s325_s1, 256, %s43_s27, [#allocation6], %s251_s22, %s251_s22, %s252_s23  }
  0x24   :  { %242 = dma.done.wait [#allocation3], 256  }
  0x25   :  { %243 = vsyncadd [#allocation3], 4294967040 }
  0x26   :  { %244 = dma.done.wait [#allocation6], 256  }
  0x27   :  { %245 = vsyncadd [#allocation6], 4294967040  ;;  %v79_v0 = vld [vmem:[#allocation2] sm:$0xff]  ;;  %v80_v1 = vld [vmem:[#allocation2 + $0x8] sm:$0xff]  ;;  %s254_s1 = smov [#allocation7]   ;;  %s255_s11 = smov [#allocation8]  }
  0x28   :  { %v83_v2 = vld [vmem:[#allocation5] sm:$0xff]  ;;  %146 = vlog2.f32 %v79_v0  ;;  %v84_v3 = vld [vmem:[#allocation5 + $0x8] sm:$0xff]  ;;  %s111_s10 = sshll.u32 %s254_s1, 4  ;;  %s121_s12 = sshll.u32 %s255_s11, 4  ;;  %s112_s10 = int_to_ptr.vmem [resolvable:$true] %s111_s10  ;;  %s122_s12 = int_to_ptr.vmem [resolvable:$true] %s121_s12 }
  0x29   :  { %v91_v4 = vsub.f32 1.0, %v83_v2  ;;  %148 = vlog2.f32 %v80_v1  ;;  %v92_v5 = vsub.f32 1.0, %v84_v3  ;;  %s198_s13 = scalar_lea.vmem %s112_s10, 128  ;;  %p203_p3 = scmp.lt.s32.totalorder %s112_s10, %s112_s10 }
  0x2a   :  { %p199_p2 = scmp.ne.s32.totalorder %s112_s10, %s198_s13  ;;  %p204_p4 = scmp.lt.s32.totalorder %s198_s13, %s198_s13 }
  0x2b   :  { %150 = vlog2.f32 %v91_v4 }
  0x2c   :  { %152 = vlog2.f32 %v92_v5  ;;  %p205_p5 = por %p204_p4, %p203_p3 }
  0x2e   :  { %p206_p6 = pnand %p205_p5, %p199_p2 }
  0x32   :  { %v147_v6 = vpop.eup %146 }
  0x33   :  { %v149_v7 = vpop.eup %148  ;;  %v88_v8 = vmul.f32 0.6931472, %v147_v6 }
  0x34   :  { %v90_v10 = vmul.f32 0.6931472, %v149_v7 }
  0x35   :  { %v151_v9 = vpop.eup %150 }
  0x36   :  { %v153_v11 = vpop.eup %152  ;;  %v94_v12 = vmul.f32 0.6931472, %v151_v9  ;;  %v98_v13 = vadd.f32 %v90_v10, %v88_v8 }
  0x37   :  { %v96_v14 = vmul.f32 0.6931472, %v153_v11 }
  0x38   :  { %100 = vst [vmem:[#allocation7] sm:$0xff] %v98_v13 }
  0x39   :  { %v102_v15 = vadd.f32 %v96_v14, %v94_v12 }
  0x3a   :  { %209 = shalt.err (!%p206_p6)
}
  0x3b   :  { %s210_s16 = scalar_lea.hbm %s326_s2, 128 }
  0x3c   :  { %p211_p7 = scmp.ne.s32.totalorder %s326_s2, %s210_s16  ;;  %p214_p8 = scmp.lt.u32.totalorder %s210_s16, %s326_s2 }
  0x3e   :  { %p216_p9 = pnand %p214_p8, %p211_p7 }
  0x40   :  { %219 = shalt.err (!%p216_p9)
}
  0x41   :  { %114 = dma.vmem_to_hbm [thread:$0]  %s112_s10, 128, %s326_s2, [#allocation4]   ;;  %104 = vst [vmem:[#allocation8] sm:$0xff] %v102_v15 }
  0x42   :  { %s220_s23 = scalar_lea.vmem %s122_s12, 128  ;;  %p225_p11 = scmp.lt.s32.totalorder %s122_s12, %s122_s12 }
  0x43   :  { %p221_p10 = scmp.ne.s32.totalorder %s122_s12, %s220_s23  ;;  %p226_p12 = scmp.lt.s32.totalorder %s220_s23, %s220_s23 }
  0x45   :  { %p227_p13 = por %p226_p12, %p225_p11 }
  0x47   :  { %p228_p0 = pnand %p227_p13, %p221_p10 }
  0x49   :  { %231 = shalt.err (!%p228_p0)
}
  0x4a   :  { %s232_s26 = scalar_lea.hbm %s327_s3, 128 }
  0x4b   :  { %p233_p1 = scmp.ne.s32.totalorder %s327_s3, %s232_s26  ;;  %p236_p2 = scmp.lt.u32.totalorder %s232_s26, %s327_s3 }
  0x4d   :  { %p238_p3 = pnand %p236_p2, %p233_p1 }
  0x4f   :  { %241 = shalt.err (!%p238_p3)
}
  0x50   :  { %124 = dma.vmem_to_hbm [thread:$0]  %s122_s12, 128, %s327_s3, [#allocation9]  }
  0x51   :  { %246 = dma.done.wait [#allocation4], 128  }
  0x52   :  { %247 = vsyncadd [#allocation4], 4294967168 }
  0x53   :  { %248 = dma.done.wait [#allocation9], 128  }
  0x54   :  { %249 = vsyncadd [#allocation9], 4294967168 }
  0x55   :  { %131 = vsyncpa [#allocation3], 1 }
  0x56   :  { %132 = vsyncpa [#allocation6], 1 }
  0x57   :  { %133 = vsyncpa [#allocation4], 1 }
  0x58   :  { %134 = vsyncpa [#allocation9], 1 }

</bundles_post_ra>
